<compile_context>
chip_gen: v6e
topology: v6e:2x2x1
jax: 0.10.0
libtpu: 0.0.40
codegen_flags: <defaults>
</compile_context>

<pallas_src>
import jax
import jax.numpy as jnp
from jax.experimental import pallas as pl
from jax.experimental.pallas import tpu as pltpu


_LANE = 128
_SINGLE_STEP_BYTES = 256 << 10   # tiny problems: one grid step, no pipelining needed
_MAX_TILE_BYTES = 8 << 20        # per x-tile cap (amortizes per-step overhead)


def _build_encoding(max_sequence_length: int, embedding_size: int) -> jnp.ndarray:
    """Deterministic sin/cos positional-encoding table, matches the torch init (f32)."""
    position = jnp.arange(0, max_sequence_length, dtype=jnp.float32)[:, None]   # (L, 1)
    div_term = jnp.exp(
        jnp.arange(0, embedding_size, 2, dtype=jnp.float32)
        * -(jnp.log(jnp.float32(10000.0)) / embedding_size)
    )                                                                           # (E/2,)
    ang = position * div_term                                                   # (L, E/2)
    enc = jnp.zeros((max_sequence_length, embedding_size), dtype=jnp.float32)
    enc = enc.at[:, 0::2].set(jnp.sin(ang))
    enc = enc.at[:, 1::2].set(jnp.cos(ang))
    return enc                                                                  # (L, E)


def _pos_enc_kernel(x_ref, enc_ref, o_ref):
    # Tiled paths:  x_ref (tile, L), enc_ref (tile, L)        -> plain add
    # Single-step:  x_ref (B, R, L), enc_ref (R, L)           -> broadcast over batch
    x = x_ref[...]
    e = enc_ref[...]
    if x.ndim == e.ndim + 1:            # trace-time branch (single-step path only)
        e = e[None]
    # enc stays f32; the add promotes, and the SUM is cast once to the output dtype.
    # Note: for bf16 x the PyTorch module would return f32; we return x.dtype (single
    # rounding of the f32 sum) — documented deliberate deviation.
    o_ref[...] = (x + e).astype(o_ref.dtype)


def _vmem_capacity_bytes() -> int:
    try:
        return int(pltpu.get_tpu_info().vmem_capacity_bytes)
    except Exception:
        return 64 << 20   # conservative default (v7x per-TensorCore VMEM)


def _cost(B: int, S: int, E: int, x_itemsize: int) -> pl.CostEstimate:
    x_bytes = B * S * E * x_itemsize
    enc_bytes = S * E * 4
    return pl.CostEstimate(flops=B * S * E, transcendentals=0,
                           bytes_accessed=2 * x_bytes + enc_bytes)


def positional_encoding(x: jnp.ndarray, encoding: jnp.ndarray) -> jnp.ndarray:
    """x: (B, S, E); encoding: (max_seq, E) float32. Returns (x + encoding[:S]) in x.dtype."""
    B, S, E = x.shape
    if S > encoding.shape[0]:
        raise ValueError(f"sequence length {S} exceeds encoding table length {encoding.shape[0]}")
    if E != encoding.shape[1]:
        raise ValueError(f"embedding size {E} != encoding table width {encoding.shape[1]}")

    itemsize = jnp.dtype(x.dtype).itemsize
    # Tiny slice (<= max_seq*E*4 bytes); for repeated calls at a fixed S callers may hoist it.
    enc = encoding[:S, :]
    cost = _cost(B, S, E, itemsize)
    F = S * E

    if F % _LANE != 0:
        # Non-lane-dense fallback (E<128 last dim -> masked stores); tile over S to bound VMEM,
        # batch innermost so the enc tile is fetched once per S-tile, not once per (S-tile, batch).
        tile_S = S if S <= 512 else 512          # multiple of 8 or equal to full S
        return pl.pallas_call(
            _pos_enc_kernel,
            out_shape=jax.ShapeDtypeStruct((B, S, E), x.dtype),
            grid_spec=pltpu.PrefetchScalarGridSpec(
                num_scalar_prefetch=0,
                grid=(pl.cdiv(S, tile_S), B),
                in_specs=[
                    pl.BlockSpec((pl.Squeezed(), tile_S, E), lambda s, b: (b, s, 0)),
                    pl.BlockSpec((tile_S, E), lambda s, b: (s, 0)),
                ],
                out_specs=pl.BlockSpec((pl.Squeezed(), tile_S, E), lambda s, b: (b, s, 0)),
            ),
            compiler_params=pltpu.CompilerParams(
                dimension_semantics=("parallel", "parallel")),
            cost_estimate=cost,
        )(x, enc)

    # ---- lane-dense path: flatten (S, E) -> (R, L), L a multiple of 128 (<= 2048) ----
    L = _LANE
    while L * 2 <= min(F, 2048) and F % (L * 2) == 0:
        L *= 2
    R = F // L
    x2 = x.reshape(B, R, L)        # pure layout plumbing (contiguous reshape, elementwise op)
    enc2 = enc.reshape(R, L)       # f32

    if B * R * L * itemsize <= _SINGLE_STEP_BYTES:
        # Truly tiny problem (e.g. the toy shape): single grid step, zero per-step overhead.
        out = pl.pallas_call(
            _pos_enc_kernel,
            out_shape=jax.ShapeDtypeStruct((B, R, L), x.dtype),
            grid_spec=pltpu.PrefetchScalarGridSpec(
                num_scalar_prefetch=0,
                grid=(1,),
                in_specs=[
                    pl.BlockSpec((B, R, L), lambda i: (0, 0, 0)),
                    pl.BlockSpec((R, L), lambda i: (0, 0)),
                ],
                out_specs=pl.BlockSpec((B, R, L), lambda i: (0, 0, 0)),
            ),
            compiler_params=pltpu.CompilerParams(dimension_semantics=("arbitrary",)),
            cost_estimate=cost,
        )(x2, enc2)
        return out.reshape(B, S, E)

    # ---- large path: grid (row-tiles, batch), batch INNERMOST ----
    # The enc block index (r, 0) is constant across consecutive steps -> Pallas skips its DMA;
    # steady-state traffic is read-x + write-out only.
    vmem_cap = _vmem_capacity_bytes()
    budget = (vmem_cap * 3) // 4                      # leave ~25% VMEM headroom
    per_row = 2 * L * (2 * itemsize + 4)              # 2 bufs x (x + out in x.dtype, enc in f32)
    max_rows_vmem = max(8, (budget // per_row) // 8 * 8)
    max_rows_cap = max(8, (_MAX_TILE_BYTES // (L * itemsize)) // 8 * 8)
    tile_R = min(R, max_rows_vmem, max_rows_cap)
    if tile_R < R:
        tile_R = max(8, (tile_R // 8) * 8)            # multiple of 8 sublanes (or full R)
    need = 2 * tile_R * L * (2 * itemsize + 4) + (2 << 20)
    vmem_limit = int(min(budget, max(need, 32 << 20)))

    out = pl.pallas_call(
        _pos_enc_kernel,
        out_shape=jax.ShapeDtypeStruct((B, R, L), x.dtype),
        grid_spec=pltpu.PrefetchScalarGridSpec(
            num_scalar_prefetch=0,
            grid=(pl.cdiv(R, tile_R), B),
            in_specs=[
                pl.BlockSpec((pl.Squeezed(), tile_R, L), lambda r, b: (b, r, 0)),
                pl.BlockSpec((tile_R, L), lambda r, b: (r, 0)),
            ],
            out_specs=pl.BlockSpec((pl.Squeezed(), tile_R, L), lambda r, b: (b, r, 0)),
        ),
        compiler_params=pltpu.CompilerParams(
            dimension_semantics=("parallel", "parallel"),
            vmem_limit_bytes=vmem_limit,
        ),
        cost_estimate=cost,
    )(x2, enc2)
    return out.reshape(B, S, E)


if __name__ == "__main__":
    embedding_size = 32
    max_sequence_length = 336
    encoding = _build_encoding(max_sequence_length, embedding_size)
    key = jax.random.PRNGKey(0)

    # 1) Toy shape from the module (B, S, E) = (2, 8, 32): lane-dense single-step path.
    B, S, E = 2, 8, embedding_size
    x = jax.random.normal(key, (B, S, E), dtype=jnp.float32)
    out = jax.block_until_ready(positional_encoding(x, encoding))
    ref = x + encoding[None, :S, :]
    assert out.shape == (B, S, E)
    assert jnp.allclose(out, ref, atol=1e-6), "mismatch vs reference (toy shape)"

    # 2) Full-length sequence, larger batch: lane-dense tiled path (grid=(row-tiles, B),
    #    batch innermost -> encoding tile DMA'd once and reused across all batch steps).
    B2, S2 = 64, max_sequence_length
    x2 = jax.random.normal(jax.random.PRNGKey(1), (B2, S2, E), dtype=jnp.float32)
    out2 = jax.block_until_ready(positional_encoding(x2, encoding))
    ref2 = x2 + encoding[None, :S2, :]
    assert jnp.allclose(out2, ref2, atol=1e-6), "mismatch vs reference (full seq, tiled)"

    # 3) Odd sequence length (S*E not a multiple of 128): S-tiled fallback path.
    B3, S3 = 2, 7
    x3 = jax.random.normal(jax.random.PRNGKey(2), (B3, S3, E), dtype=jnp.float32)
    out3 = jax.block_until_ready(positional_encoding(x3, encoding))
    ref3 = x3 + encoding[None, :S3, :]
    assert jnp.allclose(out3, ref3, atol=1e-6), "mismatch vs reference (fallback)"

    print("KERNEL_OK")
</pallas_src>

<mosaic_0001>
module attributes {stable_mosaic.version = 11 : i64} {
  func.func @_pos_enc_kernel(%arg0: i32, %arg1: memref<2x1x256xf32, #tpu.memory_space<vmem>>, %arg2: memref<1x256xf32, #tpu.memory_space<vmem>>, %arg3: memref<2x1x256xf32, #tpu.memory_space<vmem>>) attributes {dimension_semantics = [#tpu.dimension_semantics<arbitrary>], iteration_bounds = array<i64: 1>, scalar_prefetch = 0 : i64, scratch_operands = 0 : i64, tpu.core_type = #tpu.core_type<tc>, window_params = [{pipeline_mode = #tpu.pipeline_mode<synchronous>, transform_indices = @transform_0, window_bounds = array<i64: 2, 1, 256>}, {pipeline_mode = #tpu.pipeline_mode<synchronous>, transform_indices = @transform_1, window_bounds = array<i64: 1, 256>}, {pipeline_mode = #tpu.pipeline_mode<synchronous>, transform_indices = @transform_2, window_bounds = array<i64: 2, 1, 256>}]} {
    %c0 = arith.constant 0 : index
    %c0_0 = arith.constant 0 : index
    %c0_1 = arith.constant 0 : index
    %0 = vector.load %arg1[%c0, %c0_0, %c0_1] : memref<2x1x256xf32, #tpu.memory_space<vmem>>, vector<2x1x256xf32>
    %c0_2 = arith.constant 0 : index
    %c0_3 = arith.constant 0 : index
    %1 = vector.load %arg2[%c0_2, %c0_3] : memref<1x256xf32, #tpu.memory_space<vmem>>, vector<1x256xf32>
    %2 = vector.shape_cast %1 : vector<1x256xf32> to vector<1x1x256xf32>
    %3 = vector.broadcast %2 : vector<1x1x256xf32> to vector<2x1x256xf32>
    %4 = arith.addf %0, %3 : vector<2x1x256xf32>
    %c0_4 = arith.constant 0 : index
    %c0_5 = arith.constant 0 : index
    %c0_6 = arith.constant 0 : index
    %5 = vector.load %arg3[%c0_4, %c0_5, %c0_6] : memref<2x1x256xf32, #tpu.memory_space<vmem>>, vector<2x1x256xf32>
    tpu.vector_store %arg3[%c0_4, %c0_5, %c0_6], %4 {strides = array<i32>} : memref<2x1x256xf32, #tpu.memory_space<vmem>>, vector<2x1x256xf32>,
    return
  }
  func.func @transform_0(%arg0: i32) -> (i32, i32, i32) {
    %c0_i32 = arith.constant 0 : i32
    %c0_i32_0 = arith.constant 0 : i32
    %c0_i32_1 = arith.constant 0 : i32
    %c0_i32_2 = arith.constant 0 : i32
    return %c0_i32, %c0_i32_0, %c0_i32_1 : i32, i32, i32
  }
  func.func @transform_1(%arg0: i32) -> (i32, i32) {
    %c0_i32 = arith.constant 0 : i32
    %c0_i32_0 = arith.constant 0 : i32
    %c0_i32_1 = arith.constant 0 : i32
    return %c0_i32, %c0_i32_0 : i32, i32
  }
  func.func @transform_2(%arg0: i32) -> (i32, i32, i32) {
    %c0_i32 = arith.constant 0 : i32
    %c0_i32_0 = arith.constant 0 : i32
    %c0_i32_1 = arith.constant 0 : i32
    %c0_i32_2 = arith.constant 0 : i32
    return %c0_i32, %c0_i32_0, %c0_i32_1 : i32, i32, i32
  }
}

</mosaic_0001>

<bundles_post_ra>
// kernel: tpu_custom_call.1
= control target key start
LH: loop header
LB: loop body
LE: loop exit
PB: predicated region body
PF: predicated region fallthrough
CT: control target
= control target key end

     0   :  { %7 = vsyncpa [#allocation3], 0  ;;  %s173_s0 = inlined_call_operand.hbm [shape: f32[2,1,256], index: 0, kind: input, shape index: {}]   ;;  %s174_s1 = inlined_call_operand.hbm [shape: f32[1,256], index: 1, kind: input, shape index: {}]   ;;  %s175_s2 = inlined_call_operand.hbm [shape: f32[2,1,256], index: 2, kind: output, shape index: {}]  }
   0x1   :  { %8 = vsyncpa [#allocation6], 0 }
   0x2   :  { %9 = vsyncpa [#allocation4], 0  ;;  %s138_s9 = smov [#allocation2]  }
   0x3   :  { %s15_s10 = sshll.u32 %s138_s9, 4  ;;  %s16_s10 = int_to_ptr.vmem [resolvable:$true] %s15_s10 }
   0x4   :  { %s80_s11 = scalar_lea.vmem %s16_s10, 64  ;;  %p85_p1 = scmp.lt.s32.totalorder %s16_s10, %s16_s10 }
   0x5   :  { %p81_p0 = scmp.ne.s32.totalorder %s16_s10, %s80_s11  ;;  %p86_p2 = scmp.lt.s32.totalorder %s80_s11, %s80_s11 }
   0x7   :  { %p87_p3 = por %p86_p2, %p85_p1 }
   0x9   :  { %p88_p4 = pnand %p87_p3, %p81_p0 }
   0xb   :  { %91 = shalt.err (!%p88_p4)
}
   0xc   :  { %s139_s12 = smov 32   ;;  %s140_s13 = smov 2  }
   0xd   :  { %21 = dma.hbm_to_vmem [thread:$0]  %s173_s0, 64, %s16_s10, [#allocation3], %s139_s12, %s139_s12, %s140_s13  }
   0xe   :  { %s141_s16 = smov [#allocation5]  }
   0xf   :  { %s28_s17 = sshll.u32 %s141_s16, 4  ;;  %s29_s17 = int_to_ptr.vmem [resolvable:$true] %s28_s17 }
  0x10   :  { %s100_s18 = scalar_lea.vmem %s29_s17, 32  ;;  %p105_p6 = scmp.lt.s32.totalorder %s29_s17, %s29_s17 }
  0x11   :  { %p101_p5 = scmp.ne.s32.totalorder %s29_s17, %s100_s18  ;;  %p106_p7 = scmp.lt.s32.totalorder %s100_s18, %s100_s18 }
  0x13   :  { %p107_p8 = por %p106_p7, %p105_p6 }
  0x15   :  { %p108_p9 = pnand %p107_p8, %p101_p5 }
  0x17   :  { %111 = shalt.err (!%p108_p9)
}
  0x18   :  { %31 = dma.hbm_to_vmem [thread:$0]  %s174_s1, 32, %s29_s17, [#allocation6]  }
  0x19   :  { %132 = dma.done.wait [#allocation3], 64  }
  0x1a   :  { %133 = vsyncadd [#allocation3], 4294967232 }
  0x1b   :  { %134 = dma.done.wait [#allocation6], 32  }
  0x1c   :  { %135 = vsyncadd [#allocation6], 4294967264  ;;  %v43_v0 = vlaneseq  ;;  %s142_s0 = smov [#allocation7]   ;;  %v38_v1 = vld [vmem:[#allocation2] sm:$0x3] }
  0x1d   :  { %s54_s21 = sshll.u32 %s142_s0, 4  ;;  %v40_v2 = vld [vmem:[#allocation5] sm:$0x3]  ;;  %v39_v3 = vld [vmem:[#allocation2 + $0x2] sm:$0x3]  ;;  %s55_s21 = int_to_ptr.vmem [resolvable:$true] %s54_s21 }
  0x1e   :  { %vm45_vm0 = vcmp.lt.s32.totalorder %v43_v0, 256  ;;  %v41_v4 = vadd.f32 %v40_v2, %v38_v1  ;;  %v42_v5 = vadd.f32 %v40_v2, %v39_v3  ;;  %s112_s22 = scalar_lea.vmem %s55_s21, 64  ;;  %p117_p11 = scmp.lt.s32.totalorder %s55_s21, %s55_s21 }
  0x1f   :  { %p113_p10 = scmp.ne.s32.totalorder %s55_s21, %s112_s22  ;;  %p118_p12 = scmp.lt.s32.totalorder %s112_s22, %s112_s22 }
  0x20   :  { %47 = vst.msk [vmem:[#allocation7] sm:$0x3] %vm45_vm0, %v41_v4  ;;  %48 = vst.msk [vmem:[#allocation7 + $0x2] sm:$0x3] %vm45_vm0, %v42_v5 }
  0x21   :  { %p119_p13 = por %p118_p12, %p117_p11 }
  0x23   :  { %p120_p0 = pnand %p119_p13, %p113_p10 }
  0x25   :  { %123 = shalt.err (!%p120_p0)
}
  0x26   :  { %60 = dma.vmem_to_hbm [thread:$0]  %s55_s21, 64, %s175_s2, [#allocation4], %s139_s12, %s139_s12, %s140_s13  }
  0x27   :  { %136 = dma.done.wait [#allocation4], 64  }
  0x28   :  { %137 = vsyncadd [#allocation4], 4294967232 }
  0x29   :  { %64 = vsyncpa [#allocation3], 1 }
  0x2a   :  { %65 = vsyncpa [#allocation6], 1 }
  0x2b   :  { %66 = vsyncpa [#allocation4], 1 }

</bundles_post_ra>
